<compile_context>
chip_gen: v7x
topology: tpu7x:2x2x1
jax: 0.10.0
libtpu: 0.0.40
codegen_flags: <defaults>
</compile_context>

<pallas_src>
import jax
import jax.numpy as jnp
from jax import lax
from jax.experimental import pallas as pl
from jax.experimental.pallas import tpu as pltpu

EPS = 1e-5


def _transition_kernel(x_ref, scale_ref, shift_ref, w_ref, b_ref, o_ref):
    # x_ref:     [4, TN, Cin]  the four 2x2-pool phases of the same TN output pixels
    # scale_ref: [1, Cin]      gamma * rsqrt(var + eps)
    # shift_ref: [1, Cin]      beta - mean * scale
    # w_ref:     [Cin, Cout]   == torch conv.weight[:, :, 0, 0].T, pre-scaled by 0.25
    # b_ref:     [1, Cout]
    # o_ref:     [TN, Cout]
    scale = scale_ref[...]
    shift = shift_ref[...]

    # BatchNorm affine + ReLU per pooling phase (f32 on the VPU; works on v5e too).
    x = x_ref[...].astype(jnp.float32)                 # [4, TN, Cin]
    y0 = jnp.maximum(x[0] * scale + shift, 0.0)
    y1 = jnp.maximum(x[1] * scale + shift, 0.0)
    y2 = jnp.maximum(x[2] * scale + shift, 0.0)
    y3 = jnp.maximum(x[3] * scale + shift, 0.0)

    # 2x2 average pool BEFORE the 1x1 conv; the /4 is already folded into w.
    p = y0 + y1 + y2 + y3                              # [TN, Cin]

    # 1x1 conv == per-pixel matmul on the MXU, f32 accumulation.
    # (pass bf16 weights via matmul_dtype=jnp.bfloat16 on v6e/v7x for ~4x MXU rate.)
    z = jnp.dot(p.astype(w_ref.dtype), w_ref[...],
                preferred_element_type=jnp.float32)
    z = z + b_ref[...].astype(jnp.float32)
    o_ref[...] = z.astype(o_ref.dtype)


def transition_layer(x_nchw, gamma, beta, w, b, *, block_rows=None, matmul_dtype=None):
    """x_nchw: [B, Cin, H, W] (PyTorch layout). Returns [B, Cout, H//2, W//2]."""
    B, Cin, H, W = x_nchw.shape
    Cout = w.shape[1]
    Ho, Wo = H // 2, W // 2
    N = B * Ho * Wo

    # --- pass 1 (plain XLA, memory-bound): BatchNorm batch stats on the FULL x ----
    xf = x_nchw.astype(jnp.float32)
    mean = jnp.mean(xf, axis=(0, 2, 3))
    var = jnp.var(xf, axis=(0, 2, 3))                       # biased, like BatchNorm2d
    scale = (gamma.astype(jnp.float32) * lax.rsqrt(var + EPS)).reshape(1, Cin)
    shift = beta.astype(jnp.float32).reshape(1, Cin) - mean.reshape(1, Cin) * scale

    # --- single layout pass: split the four 2x2-pool phases, Cin becomes lane dim ---
    # Floors odd spatial dims exactly like nn.AvgPool2d(2, 2).
    xc = x_nchw[:, :, : 2 * Ho, : 2 * Wo]
    x4 = xc.reshape(B, Cin, Ho, 2, Wo, 2)
    x4 = jnp.transpose(x4, (3, 5, 0, 2, 4, 1)).reshape(4, N, Cin)

    # --- row-tile choice: biggest 8-aligned tile keeping the input block <= ~4 MiB --
    # (double-buffered inputs + outputs stay well under v7x's scoped VMEM)
    itemsize = x4.dtype.itemsize
    if block_rows is None:
        cap_rows = (4 * 1024 * 1024) // max(1, 4 * Cin * itemsize)
        block_rows = int(min(1024, max(8, cap_rows)))
    block_rows = int(min(block_rows, -(-N // 8) * 8))        # never exceed padded N
    block_rows = max(8, (block_rows // 8) * 8)               # 8-aligned sublane tile

    num_tiles = -(-N // block_rows)
    Np = num_tiles * block_rows
    if Np != N:                                              # ragged N -> pad rows
        x4 = jnp.pad(x4, ((0, 0), (0, Np - N), (0, 0)))
    grid = (num_tiles,)

    # Fold the 2x2-pool 1/4 into the (tiny) conv weight once, outside the kernel.
    w_eff = w.astype(jnp.float32) * 0.25
    if matmul_dtype is not None:
        w_eff = w_eff.astype(matmul_dtype)
    b_in = b.reshape(1, Cout).astype(jnp.float32)

    out_flat = pl.pallas_call(
        _transition_kernel,
        out_shape=jax.ShapeDtypeStruct((Np, Cout), x_nchw.dtype),
        grid=grid,
        in_specs=[
            pl.BlockSpec((4, block_rows, Cin), lambda i: (0, i, 0)),
            pl.BlockSpec((1, Cin), lambda i: (0, 0)),
            pl.BlockSpec((1, Cin), lambda i: (0, 0)),
            pl.BlockSpec((Cin, Cout), lambda i: (0, 0)),
            pl.BlockSpec((1, Cout), lambda i: (0, 0)),
        ],
        out_specs=pl.BlockSpec((block_rows, Cout), lambda i: (i, 0)),
        compiler_params=pltpu.CompilerParams(
            dimension_semantics=("parallel",),   # row tiles shard across both TCs on v7x
            vmem_limit_bytes=32 * 1024 * 1024,
        ),
    )(x4, scale, shift, w_eff, b_in)

    # [Np, Cout] -> NCHW (small tensor; transpose required only to match the torch API)
    out = out_flat[:N].reshape(B, Ho, Wo, Cout)
    return jnp.transpose(out, (0, 3, 1, 2))


def reference(x_nchw, gamma, beta, w, b):
    """Pure-JAX reference with identical semantics (for verification)."""
    x = x_nchw.astype(jnp.float32)
    mean = jnp.mean(x, axis=(0, 2, 3), keepdims=True)
    var = jnp.mean((x - mean) ** 2, axis=(0, 2, 3), keepdims=True)
    xhat = (x - mean) / jnp.sqrt(var + EPS)
    y = xhat * gamma[None, :, None, None] + beta[None, :, None, None]
    y = jnp.maximum(y, 0.0)
    z = jnp.einsum("bchw,cd->bdhw", y, w) + b[None, :, None, None]
    B, Cout, H, W = z.shape
    Ho, Wo = H // 2, W // 2
    z = z[:, :, : 2 * Ho, : 2 * Wo].reshape(B, Cout, Ho, 2, Wo, 2)
    return jnp.mean(z, axis=(3, 5))


if __name__ == "__main__":
    key = jax.random.PRNGKey(0)

    # Test 1: spec-sized toy shapes (single row tile).
    B, Cin, Cout, H, W = 2, 4, 2, 16, 16
    k_x, k_w, k_b, key = jax.random.split(key, 4)
    x = jax.random.normal(k_x, (B, Cin, H, W), dtype=jnp.float32)
    gamma = jnp.ones((Cin,), dtype=jnp.float32)     # BatchNorm2d default init
    beta = jnp.zeros((Cin,), dtype=jnp.float32)
    w = 0.1 * jax.random.normal(k_w, (Cin, Cout), dtype=jnp.float32)
    b = 0.1 * jax.random.normal(k_b, (Cout,), dtype=jnp.float32)

    out = jax.block_until_ready(transition_layer(x, gamma, beta, w, b))
    ref = reference(x, gamma, beta, w, b)
    assert out.shape == (B, Cout, H // 2, W // 2), out.shape
    assert jnp.allclose(out, ref, atol=1e-4, rtol=1e-4), "mismatch vs reference (test 1)"

    # Test 2: force a multi-tile grid (block_rows=32 -> grid of 4) to exercise the
    # index_map / pipelined path.
    B, Cin, Cout, H, W = 2, 8, 4, 16, 16
    k_x, k_w, k_b, key = jax.random.split(key, 4)
    x = jax.random.normal(k_x, (B, Cin, H, W), dtype=jnp.float32)
    gamma = 1.0 + 0.1 * jax.random.normal(key, (Cin,), dtype=jnp.float32)
    beta = 0.1 * jnp.ones((Cin,), dtype=jnp.float32)
    w = 0.1 * jax.random.normal(k_w, (Cin, Cout), dtype=jnp.float32)
    b = 0.1 * jax.random.normal(k_b, (Cout,), dtype=jnp.float32)

    out = jax.block_until_ready(transition_layer(x, gamma, beta, w, b, block_rows=32))
    ref = reference(x, gamma, beta, w, b)
    assert out.shape == (B, Cout, H // 2, W // 2), out.shape
    assert jnp.allclose(out, ref, atol=1e-4, rtol=1e-4), "mismatch vs reference (test 2)"

    # Test 3: odd spatial dims (AvgPool floor) and N not divisible by the row tile
    # (exercises the padding path).
    B, Cin, Cout, H, W = 1, 8, 8, 11, 11
    k_x, k_w, k_b, key = jax.random.split(key, 4)
    x = jax.random.normal(k_x, (B, Cin, H, W), dtype=jnp.float32)
    gamma = 1.0 + 0.05 * jax.random.normal(key, (Cin,), dtype=jnp.float32)
    beta = 0.05 * jnp.ones((Cin,), dtype=jnp.float32)
    w = 0.1 * jax.random.normal(k_w, (Cin, Cout), dtype=jnp.float32)
    b = 0.1 * jax.random.normal(k_b, (Cout,), dtype=jnp.float32)

    out = jax.block_until_ready(transition_layer(x, gamma, beta, w, b))
    ref = reference(x, gamma, beta, w, b)
    assert out.shape == (B, Cout, H // 2, W // 2), out.shape
    assert jnp.allclose(out, ref, atol=1e-4, rtol=1e-4), "mismatch vs reference (test 3)"

    print("KERNEL_OK")
</pallas_src>

<mosaic_0001>
module attributes {stable_mosaic.version = 11 : i64} {
  func.func @_transition_kernel(%arg0: i32, %arg1: memref<4x128x4xf32, #tpu.memory_space<vmem>>, %arg2: memref<1x4xf32, #tpu.memory_space<vmem>>, %arg3: memref<1x4xf32, #tpu.memory_space<vmem>>, %arg4: memref<4x2xf32, #tpu.memory_space<vmem>>, %arg5: memref<1x2xf32, #tpu.memory_space<vmem>>, %arg6: memref<128x2xf32, #tpu.memory_space<vmem>>) attributes {dimension_semantics = [#tpu.dimension_semantics<parallel>], iteration_bounds = array<i64: 1>, scalar_prefetch = 0 : i64, scratch_operands = 0 : i64, tpu.core_type = #tpu.core_type<tc>, window_params = [{transform_indices = @transform_0, window_bounds = array<i64: 4, 128, 4>}, {pipeline_mode = #tpu.pipeline_mode<synchronous>, transform_indices = @transform_1, window_bounds = array<i64: 1, 4>}, {pipeline_mode = #tpu.pipeline_mode<synchronous>, transform_indices = @transform_2, window_bounds = array<i64: 1, 4>}, {pipeline_mode = #tpu.pipeline_mode<synchronous>, transform_indices = @transform_3, window_bounds = array<i64: 4, 2>}, {pipeline_mode = #tpu.pipeline_mode<synchronous>, transform_indices = @transform_4, window_bounds = array<i64: 1, 2>}, {transform_indices = @transform_5, window_bounds = array<i64: 128, 2>}]} {
    %c0 = arith.constant 0 : index
    %c0_0 = arith.constant 0 : index
    %0 = vector.load %arg2[%c0, %c0_0] : memref<1x4xf32, #tpu.memory_space<vmem>>, vector<1x4xf32>
    %c0_1 = arith.constant 0 : index
    %c0_2 = arith.constant 0 : index
    %1 = vector.load %arg3[%c0_1, %c0_2] : memref<1x4xf32, #tpu.memory_space<vmem>>, vector<1x4xf32>
    %c0_3 = arith.constant 0 : index
    %c0_4 = arith.constant 0 : index
    %c0_5 = arith.constant 0 : index
    %2 = vector.load %arg1[%c0_3, %c0_4, %c0_5] : memref<4x128x4xf32, #tpu.memory_space<vmem>>, vector<4x128x4xf32>
    %3 = vector.extract_strided_slice %2 {offsets = [0, 0, 0], sizes = [1, 128, 4], strides = [1, 1, 1]} : vector<4x128x4xf32> to vector<1x128x4xf32>
    %4 = vector.shape_cast %3 : vector<1x128x4xf32> to vector<128x4xf32>
    %5 = vector.broadcast %0 : vector<1x4xf32> to vector<128x4xf32>
    %6 = arith.mulf %4, %5 : vector<128x4xf32>
    %7 = vector.broadcast %1 : vector<1x4xf32> to vector<128x4xf32>
    %8 = arith.addf %6, %7 : vector<128x4xf32>
    %cst = arith.constant 0.000000e+00 : f32
    %9 = vector.broadcast %cst : f32 to vector<128x4xf32>
    %10 = arith.maximumf %8, %9 : vector<128x4xf32>
    %11 = vector.extract_strided_slice %2 {offsets = [1, 0, 0], sizes = [1, 128, 4], strides = [1, 1, 1]} : vector<4x128x4xf32> to vector<1x128x4xf32>
    %12 = vector.shape_cast %11 : vector<1x128x4xf32> to vector<128x4xf32>
    %13 = vector.broadcast %0 : vector<1x4xf32> to vector<128x4xf32>
    %14 = arith.mulf %12, %13 : vector<128x4xf32>
    %15 = vector.broadcast %1 : vector<1x4xf32> to vector<128x4xf32>
    %16 = arith.addf %14, %15 : vector<128x4xf32>
    %cst_6 = arith.constant 0.000000e+00 : f32
    %17 = vector.broadcast %cst_6 : f32 to vector<128x4xf32>
    %18 = arith.maximumf %16, %17 : vector<128x4xf32>
    %19 = vector.extract_strided_slice %2 {offsets = [2, 0, 0], sizes = [1, 128, 4], strides = [1, 1, 1]} : vector<4x128x4xf32> to vector<1x128x4xf32>
    %20 = vector.shape_cast %19 : vector<1x128x4xf32> to vector<128x4xf32>
    %21 = vector.broadcast %0 : vector<1x4xf32> to vector<128x4xf32>
    %22 = arith.mulf %20, %21 : vector<128x4xf32>
    %23 = vector.broadcast %1 : vector<1x4xf32> to vector<128x4xf32>
    %24 = arith.addf %22, %23 : vector<128x4xf32>
    %cst_7 = arith.constant 0.000000e+00 : f32
    %25 = vector.broadcast %cst_7 : f32 to vector<128x4xf32>
    %26 = arith.maximumf %24, %25 : vector<128x4xf32>
    %27 = vector.extract_strided_slice %2 {offsets = [3, 0, 0], sizes = [1, 128, 4], strides = [1, 1, 1]} : vector<4x128x4xf32> to vector<1x128x4xf32>
    %28 = vector.shape_cast %27 : vector<1x128x4xf32> to vector<128x4xf32>
    %29 = vector.broadcast %0 : vector<1x4xf32> to vector<128x4xf32>
    %30 = arith.mulf %28, %29 : vector<128x4xf32>
    %31 = vector.broadcast %1 : vector<1x4xf32> to vector<128x4xf32>
    %32 = arith.addf %30, %31 : vector<128x4xf32>
    %cst_8 = arith.constant 0.000000e+00 : f32
    %33 = vector.broadcast %cst_8 : f32 to vector<128x4xf32>
    %34 = arith.maximumf %32, %33 : vector<128x4xf32>
    %35 = arith.addf %10, %18 : vector<128x4xf32>
    %36 = arith.addf %35, %26 : vector<128x4xf32>
    %37 = arith.addf %36, %34 : vector<128x4xf32>
    %c0_9 = arith.constant 0 : index
    %c0_10 = arith.constant 0 : index
    %38 = vector.load %arg4[%c0_9, %c0_10] : memref<4x2xf32, #tpu.memory_space<vmem>>, vector<4x2xf32>
    %cst_11 = arith.constant dense<0.000000e+00> : vector<128x2xf32>
    %39 = tpu.matmul %37, %38, %cst_11 {dimension_numbers = #tpu.dot_dimension_numbers<[1], [0], [0], [1], [0, 0, 1, 1], [], []>} : vector<128x4xf32>, vector<4x2xf32>, vector<128x2xf32> -> vector<128x2xf32>
    %c0_12 = arith.constant 0 : index
    %c0_13 = arith.constant 0 : index
    %40 = vector.load %arg5[%c0_12, %c0_13] : memref<1x2xf32, #tpu.memory_space<vmem>>, vector<1x2xf32>
    %41 = vector.broadcast %40 : vector<1x2xf32> to vector<128x2xf32>
    %42 = arith.addf %39, %41 : vector<128x2xf32>
    %c0_14 = arith.constant 0 : index
    %c0_15 = arith.constant 0 : index
    %43 = vector.load %arg6[%c0_14, %c0_15] : memref<128x2xf32, #tpu.memory_space<vmem>>, vector<128x2xf32>
    tpu.vector_store %arg6[%c0_14, %c0_15], %42 {strides = array<i32>} : memref<128x2xf32, #tpu.memory_space<vmem>>, vector<128x2xf32>,
    return
  }
  func.func @transform_0(%arg0: i32) -> (i32, i32, i32) {
    %c0_i32 = arith.constant 0 : i32
    %c0_i32_0 = arith.constant 0 : i32
    %c0_i32_1 = arith.constant 0 : i32
    return %c0_i32, %arg0, %c0_i32_0 : i32, i32, i32
  }
  func.func @transform_1(%arg0: i32) -> (i32, i32) {
    %c0_i32 = arith.constant 0 : i32
    %c0_i32_0 = arith.constant 0 : i32
    %c0_i32_1 = arith.constant 0 : i32
    return %c0_i32, %c0_i32_0 : i32, i32
  }
  func.func @transform_2(%arg0: i32) -> (i32, i32) {
    %c0_i32 = arith.constant 0 : i32
    %c0_i32_0 = arith.constant 0 : i32
    %c0_i32_1 = arith.constant 0 : i32
    return %c0_i32, %c0_i32_0 : i32, i32
  }
  func.func @transform_3(%arg0: i32) -> (i32, i32) {
    %c0_i32 = arith.constant 0 : i32
    %c0_i32_0 = arith.constant 0 : i32
    %c0_i32_1 = arith.constant 0 : i32
    return %c0_i32, %c0_i32_0 : i32, i32
  }
  func.func @transform_4(%arg0: i32) -> (i32, i32) {
    %c0_i32 = arith.constant 0 : i32
    %c0_i32_0 = arith.constant 0 : i32
    %c0_i32_1 = arith.constant 0 : i32
    return %c0_i32, %c0_i32_0 : i32, i32
  }
  func.func @transform_5(%arg0: i32) -> (i32, i32) {
    %c0_i32 = arith.constant 0 : i32
    %c0_i32_0 = arith.constant 0 : i32
    return %arg0, %c0_i32 : i32, i32
  }
}

</mosaic_0001>

<bundles_post_ra>
// kernel: tpu_custom_call.1
= control target key start
LH: loop header
LB: loop body
LE: loop exit
PB: predicated region body
PF: predicated region fallthrough
CT: control target
= control target key end

     0   :  { %vm395_vm0 = vcmask 1043456   ;;  %vm346_vm1 = vcmask 31744   ;;  %vm544_vm2 = vcmask 15360   ;;  %s1076_s3 = inlined_call_operand.vmem [shape: f32[4,2], index: 3, kind: input, shape index: {}]   ;;  %s1077_s0 = inlined_call_operand.vmem [shape: f32[4,128,4], index: 0, kind: input, shape index: {}]   ;;  %s1078_s1 = inlined_call_operand.vmem [shape: f32[1,4], index: 1, kind: input, shape index: {}]   ;;  %s1079_s2 = inlined_call_operand.vmem [shape: f32[1,4], index: 2, kind: input, shape index: {}]   ;;  %s1080_s4 = inlined_call_operand.vmem [shape: f32[1,2], index: 4, kind: input, shape index: {}]   ;;  %s1081_s5 = inlined_call_operand.vmem [shape: f32[128,2], index: 5, kind: output, shape index: {}]  }
   0x1   :  { %v338_v0 = vld [vmem:[%s1076_s3] sm:$0xf]  ;;  %v23_v25 = vld [vmem:[%s1077_s0 + $0x8] sm:$0xff]  ;;  %v24_v61 = vld [vmem:[%s1077_s0 + $0x10] sm:$0xff] }
   0x2   :  { %v666_v1 = vld [vmem:[%s1078_s1] ss:$0 sm:$0xff]  ;;  %602 = vmatprep.subr.msk.mxu0 %vm395_vm0, %v338_v0  ;;  %628 = vmatprep.subr.msk.mxu1 %vm395_vm0, %v338_v0  ;;  %v39_v26 = vld [vmem:[%s1077_s0 + $0x88] sm:$0xff]  ;;  %v40_v62 = vld [vmem:[%s1077_s0 + $0x90] sm:$0xff] }
   0x3   :  { %v671_v2 = vld [vmem:[%s1079_s2] ss:$0 sm:$0xff]  ;;  %603 = vmatpush3.msk.msra.mxu0 %vm395_vm0, %v338_v0  ;;  %629 = vmatpush3.msk.msra.mxu1 %vm395_vm0, %v338_v0  ;;  %v55_v31 = vld [vmem:[%s1077_s0 + $0x108] sm:$0xff]  ;;  %v93_v40 = vmul.f32 %v666_v1, %v23_v25  ;;  %v147_v41 = vmul.f32 %v666_v1, %v39_v26  ;;  %v56_v63 = vld [vmem:[%s1077_s0 + $0x110] sm:$0xff] }
   0x4   :  { %v22_v3 = vld [vmem:[%s1077_s0] sm:$0xff]  ;;  %v71_v32 = vld [vmem:[%s1077_s0 + $0x188] sm:$0xff]  ;;  %v195_v45 = vmul.f32 %v666_v1, %v55_v31  ;;  %v64_v25 = vld [vmem:[%s1077_s0 + $0x150] sm:$0xff] }
   0x5   :  { %v38_v4 = vld [vmem:[%s1077_s0 + $0x80] sm:$0xff]  ;;  %v92_v7 = vmul.f32 %v666_v1, %v22_v3  ;;  %v31_v37 = vld [vmem:[%s1077_s0 + $0x48] sm:$0xff]  ;;  %v243_v46 = vmul.f32 %v666_v1, %v71_v32  ;;  %v115_v48 = vadd.f32 %v671_v2, %v93_v40  ;;  %v163_v49 = vadd.f32 %v671_v2, %v147_v41  ;;  %v25_v31 = vld [vmem:[%s1077_s0 + $0x18] sm:$0xff] }
   0x6   :  { %v54_v5 = vld [vmem:[%s1077_s0 + $0x100] sm:$0xff]  ;;  %v146_v8 = vmul.f32 %v666_v1, %v38_v4  ;;  %v47_v42 = vld [vmem:[%s1077_s0 + $0xc8] sm:$0xff]  ;;  %v101_v50 = vmul.f32 %v666_v1, %v31_v37  ;;  %v211_v52 = vadd.f32 %v671_v2, %v195_v45  ;;  %v204_v40 = vmul.f32 %v666_v1, %v64_v25 }
   0x7   :  { %v70_v6 = vld [vmem:[%s1077_s0 + $0x180] sm:$0xff]  ;;  %v194_v9 = vmul.f32 %v666_v1, %v54_v5  ;;  %v114_v17 = vadd.f32 %v671_v2, %v92_v7  ;;  %v259_v53 = vadd.f32 %v671_v2, %v243_v46  ;;  %v63_v54 = vld [vmem:[%s1077_s0 + $0x148] sm:$0xff]  ;;  %v155_v56 = vmul.f32 %v666_v1, %v47_v42 }
   0x8   :  { %v30_v10 = vld [vmem:[%s1077_s0 + $0x40] sm:$0xff]  ;;  %v242_v12 = vmul.f32 %v666_v1, %v70_v6  ;;  %v162_v18 = vadd.f32 %v671_v2, %v146_v8  ;;  %v79_v55 = vld [vmem:[%s1077_s0 + $0x1c8] sm:$0xff]  ;;  %v131_v58 = vmax.f32 %v115_v48, 0.0  ;;  %v179_v59 = vmax.f32 %v163_v49, 0.0  ;;  %v72_v6 = vld [vmem:[%s1077_s0 + $0x190] sm:$0xff] }
   0x9   :  { %v46_v11 = vld [vmem:[%s1077_s0 + $0xc0] sm:$0xff]  ;;  %v100_v15 = vmul.f32 %v666_v1, %v30_v10  ;;  %v210_v19 = vadd.f32 %v671_v2, %v194_v9  ;;  %v130_v27 = vmax.f32 %v114_v17, 0.0  ;;  %v123_v60 = vadd.f32 %v671_v2, %v101_v50  ;;  %v73_v49 = vld [vmem:[%s1077_s0 + $0x198] sm:$0xff] }
   0xa   :  { %v62_v13 = vld [vmem:[%s1077_s0 + $0x140] sm:$0xff]  ;;  %v154_v16 = vmul.f32 %v666_v1, %v46_v11  ;;  %v258_v21 = vadd.f32 %v671_v2, %v242_v12  ;;  %v178_v28 = vmax.f32 %v162_v18, 0.0  ;;  %v227_v3 = vmax.f32 %v211_v52, 0.0 }
   0xb   :  { %v78_v14 = vld [vmem:[%s1077_s0 + $0x1c0] sm:$0xff]  ;;  %v202_v20 = vmul.f32 %v666_v1, %v62_v13  ;;  %v122_v22 = vadd.f32 %v671_v2, %v100_v15  ;;  %v226_v29 = vmax.f32 %v210_v19, 0.0  ;;  %v275_v4 = vmax.f32 %v259_v53, 0.0  ;;  %v32_v19 = vld [vmem:[%s1077_s0 + $0x50] sm:$0xff] }
   0xc   :  { %v170_v23 = vadd.f32 %v671_v2, %v154_v16  ;;  %v250_v24 = vmul.f32 %v666_v1, %v78_v14  ;;  %v274_v33 = vmax.f32 %v258_v21, 0.0  ;;  %v290_v38 = vadd.f32 %v178_v28, %v130_v27 }
   0xd   :  { %v218_v30 = vadd.f32 %v671_v2, %v202_v20  ;;  %v138_v34 = vmax.f32 %v122_v22, 0.0  ;;  %v171_v5 = vadd.f32 %v671_v2, %v155_v56  ;;  %v291_v7 = vadd.f32 %v179_v59, %v131_v58 }
   0xe   :  { %v186_v35 = vmax.f32 %v170_v23, 0.0  ;;  %v266_v36 = vadd.f32 %v671_v2, %v250_v24  ;;  %v306_v47 = vadd.f32 %v290_v38, %v226_v29  ;;  %v139_v8 = vmax.f32 %v123_v60, 0.0  ;;  %v48_v24 = vld [vmem:[%s1077_s0 + $0xd0] sm:$0xff]  ;;  %v49_v60 = vld [vmem:[%s1077_s0 + $0xd8] sm:$0xff] }
   0xf   :  { %v234_v39 = vmax.f32 %v218_v30, 0.0  ;;  %v203_v9 = vmul.f32 %v666_v1, %v63_v54  ;;  %v251_v10 = vmul.f32 %v666_v1, %v79_v55  ;;  %v187_v11 = vmax.f32 %v171_v5, 0.0  ;;  %v80_v30 = vld [vmem:[%s1077_s0 + $0x1d0] sm:$0xff]  ;;  %v33_v55 = vld [vmem:[%s1077_s0 + $0x58] sm:$0xff] }
  0x10   :  { %v282_v43 = vmax.f32 %v266_v36, 0.0  ;;  %v298_v44 = vadd.f32 %v186_v35, %v138_v34  ;;  %v322_v57 = vadd.f32 %v306_v47, %v274_v33  ;;  %v94_v12 = vmul.f32 %v666_v1, %v24_v61  ;;  %v41_v36 = vld [vmem:[%s1077_s0 + $0x98] sm:$0xff] }
  0x11   :  { %v148_v13 = vmul.f32 %v666_v1, %v40_v62  ;;  %v196_v14 = vmul.f32 %v666_v1, %v56_v63  ;;  %v307_v15 = vadd.f32 %v291_v7, %v227_v3  ;;  %v219_v16 = vadd.f32 %v671_v2, %v203_v9  ;;  %v65_v61 = vld [vmem:[%s1077_s0 + $0x158] sm:$0xff] }
  0x12   :  { %v314_v51 = vadd.f32 %v298_v44, %v234_v39  ;;  %604 = vmatprep.mubr.msk.f32.mxu0 %vm346_vm1, %v322_v57  ;;  %v267_v17 = vadd.f32 %v671_v2, %v251_v10  ;;  %v244_v18 = vmul.f32 %v666_v1, %v72_v6  ;;  %v299_v20 = vadd.f32 %v187_v11, %v139_v8  ;;  %v57_v44 = vld [vmem:[%s1077_s0 + $0x118] sm:$0xff] }
  0x13   :  { %v116_v21 = vadd.f32 %v671_v2, %v94_v12  ;;  %v164_v22 = vadd.f32 %v671_v2, %v148_v13  ;;  %v212_v23 = vadd.f32 %v671_v2, %v196_v14  ;;  %v323_v26 = vadd.f32 %v307_v15, %v275_v4  ;;  %v81_v62 = vld [vmem:[%s1077_s0 + $0x1d8] sm:$0xff]  ;;  %v26_v13 = vld [vmem:[%s1077_s0 + $0x20] sm:$0xff] }
  0x14   :  { %v330_v0 = vadd.f32 %v314_v51, %v282_v43  ;;  %v235_v27 = vmax.f32 %v219_v16, 0.0  ;;  %v283_v28 = vmax.f32 %v267_v17, 0.0  ;;  %v260_v29 = vadd.f32 %v671_v2, %v244_v18  ;;  %v42_v18 = vld [vmem:[%s1077_s0 + $0xa0] sm:$0xff] }
  0x15   :  { %v132_v32 = vmax.f32 %v116_v21, 0.0  ;;  %v180_v33 = vmax.f32 %v164_v22, 0.0  ;;  %v228_v34 = vmax.f32 %v212_v23, 0.0  ;;  %v102_v35 = vmul.f32 %v666_v1, %v32_v19  ;;  %605 = vmatmul.mubr.msk.f32.vlgmr.msra.gmra.mrb[0].mxu0 %vm346_vm1, %v323_v26  ;;  %v58_v23 = vld [vmem:[%s1077_s0 + $0x120] sm:$0xff] }
  0x16   :  { %616 = vmatprep.mubr.msk.f32.mxu1 %vm346_vm1, %v330_v0  ;;  %v315_v37 = vadd.f32 %v299_v20, %v235_v27  ;;  %v276_v38 = vmax.f32 %v260_v29, 0.0  ;;  %v156_v39 = vmul.f32 %v666_v1, %v48_v24  ;;  %v252_v43 = vmul.f32 %v666_v1, %v80_v30  ;;  %v74_v24 = vld [vmem:[%s1077_s0 + $0x1a0] sm:$0xff] }
  0x17   :  { %v292_v41 = vadd.f32 %v180_v33, %v132_v32  ;;  %v124_v42 = vadd.f32 %v671_v2, %v102_v35  ;;  %v95_v45 = vmul.f32 %v666_v1, %v25_v31  ;;  %v220_v48 = vadd.f32 %v671_v2, %v204_v40  ;;  %v34_v29 = vld [vmem:[%s1077_s0 + $0x60] sm:$0xff] }
  0x18   :  { %v331_v46 = vadd.f32 %v315_v37, %v283_v28  ;;  %v172_v47 = vadd.f32 %v671_v2, %v156_v39  ;;  %v149_v50 = vmul.f32 %v666_v1, %v41_v36  ;;  %v268_v53 = vadd.f32 %v671_v2, %v252_v43  ;;  %v50_v30 = vld [vmem:[%s1077_s0 + $0xe0] sm:$0xff] }
  0x19   :  { %v308_v51 = vadd.f32 %v292_v41, %v228_v34  ;;  %v140_v52 = vmax.f32 %v124_v42, 0.0  ;;  %v117_v54 = vadd.f32 %v671_v2, %v95_v45  ;;  %v236_v57 = vmax.f32 %v220_v48, 0.0  ;;  %v66_v35 = vld [vmem:[%s1077_s0 + $0x160] sm:$0xff] }
  0x1a   :  { %617 = vmatmul.mubr.msk.f32.vlgmr.msra.gmra.mrb[0].mxu1 %vm346_vm1, %v331_v46  ;;  %v188_v56 = vmax.f32 %v172_v47, 0.0  ;;  %v165_v58 = vadd.f32 %v671_v2, %v149_v50  ;;  %v197_v59 = vmul.f32 %v666_v1, %v57_v44  ;;  %v284_v0 = vmax.f32 %v268_v53, 0.0  ;;  %v82_v42 = vld [vmem:[%s1077_s0 + $0x1e0] sm:$0xff]  ;;  %v27_v53 = vld [vmem:[%s1077_s0 + $0x28] sm:$0xff] }
  0x1b   :  { %v324_v63 = vadd.f32 %v308_v51, %v276_v38  ;;  %v133_v3 = vmax.f32 %v117_v54, 0.0  ;;  %v245_v4 = vmul.f32 %v666_v1, %v73_v49  ;;  %v103_v8 = vmul.f32 %v666_v1, %v33_v55  ;;  %v43_v54 = vld [vmem:[%s1077_s0 + $0xa8] sm:$0xff] }
  0x1c   :  { %v300_v5 = vadd.f32 %v188_v56, %v140_v52  ;;  %v181_v6 = vmax.f32 %v165_v58, 0.0  ;;  %v213_v7 = vadd.f32 %v671_v2, %v197_v59  ;;  %v157_v10 = vmul.f32 %v666_v1, %v49_v60  ;;  %v59_v59 = vld [vmem:[%s1077_s0 + $0x128] sm:$0xff] }
  0x1d   :  { %607 = vmatprep.mubr.msk.f32.mxu0 %vm346_vm1, %v324_v63  ;;  %v261_v9 = vadd.f32 %v671_v2, %v245_v4  ;;  %v205_v11 = vmul.f32 %v666_v1, %v65_v61  ;;  %v253_v12 = vmul.f32 %v666_v1, %v81_v62  ;;  %v125_v17 = vadd.f32 %v671_v2, %v103_v8  ;;  %v75_v60 = vld [vmem:[%s1077_s0 + $0x1a8] sm:$0xff] }
  0x1e   :  { %v316_v14 = vadd.f32 %v300_v5, %v236_v57  ;;  %v229_v15 = vmax.f32 %v213_v7, 0.0  ;;  %v293_v16 = vadd.f32 %v181_v6, %v133_v3  ;;  %v173_v20 = vadd.f32 %v671_v2, %v157_v10  ;;  %v35_v3 = vld [vmem:[%s1077_s0 + $0x68] sm:$0xff] }
  0x1f   :  { %v277_v19 = vmax.f32 %v261_v9, 0.0  ;;  %v221_v21 = vadd.f32 %v671_v2, %v205_v11  ;;  %v269_v22 = vadd.f32 %v671_v2, %v253_v12  ;;  %v141_v27 = vmax.f32 %v125_v17, 0.0  ;;  %v51_v12 = vld [vmem:[%s1077_s0 + $0xe8] sm:$0xff] }
  0x20   :  { %v332_v25 = vadd.f32 %v316_v14, %v284_v0  ;;  %v309_v26 = vadd.f32 %v293_v16, %v229_v15  ;;  %v96_v28 = vmul.f32 %v666_v1, %v26_v13  ;;  %v189_v31 = vmax.f32 %v173_v20, 0.0  ;;  %v67_v16 = vld [vmem:[%s1077_s0 + $0x168] sm:$0xff] }
  0x21   :  { %v237_v32 = vmax.f32 %v221_v21, 0.0  ;;  %v285_v33 = vmax.f32 %v269_v22, 0.0  ;;  %v150_v34 = vmul.f32 %v666_v1, %v42_v18  ;;  %v198_v38 = vmul.f32 %v666_v1, %v58_v23  ;;  %v83_v22 = vld [vmem:[%s1077_s0 + $0x1e8] sm:$0xff] }
  0x22   :  { %619 = vmatprep.mubr.msk.f32.mxu1 %vm346_vm1, %v332_v25  ;;  %v325_v36 = vadd.f32 %v309_v26, %v277_v19  ;;  %v118_v37 = vadd.f32 %v671_v2, %v96_v28  ;;  %v246_v39 = vmul.f32 %v666_v1, %v74_v24  ;;  %v301_v40 = vadd.f32 %v189_v31, %v141_v27  ;;  %v28_v27 = vld [vmem:[%s1077_s0 + $0x30] sm:$0xff] }
  0x23   :  { %v166_v41 = vadd.f32 %v671_v2, %v150_v34  ;;  %v104_v43 = vmul.f32 %v666_v1, %v34_v29  ;;  %v158_v44 = vmul.f32 %v666_v1, %v50_v30  ;;  %v214_v46 = vadd.f32 %v671_v2, %v198_v38  ;;  %v44_v28 = vld [vmem:[%s1077_s0 + $0xb0] sm:$0xff] }
  0x24   :  { %608 = vmatmul.mubr.msk.f32.gmra.mrb[2].mxu0 %vm346_vm1, %v325_v36  ;;  %v134_v45 = vmax.f32 %v118_v37, 0.0  ;;  %v262_v47 = vadd.f32 %v671_v2, %v246_v39  ;;  %v206_v48 = vmul.f32 %v666_v1, %v66_v35  ;;  %v317_v49 = vadd.f32 %v301_v40, %v237_v32  ;;  %v60_v29 = vld [vmem:[%s1077_s0 + $0x130] sm:$0xff] }
  0x25   :  { %v182_v50 = vmax.f32 %v166_v41, 0.0  ;;  %v126_v51 = vadd.f32 %v671_v2, %v104_v43  ;;  %v174_v52 = vadd.f32 %v671_v2, %v158_v44  ;;  %v230_v55 = vmax.f32 %v214_v46, 0.0  ;;  %v76_v34 = vld [vmem:[%s1077_s0 + $0x1b0] sm:$0xff] }
  0x26   :  { %v278_v56 = vmax.f32 %v262_v47, 0.0  ;;  %v222_v57 = vadd.f32 %v671_v2, %v206_v48  ;;  %v254_v58 = vmul.f32 %v666_v1, %v82_v42  ;;  %v333_v61 = vadd.f32 %v317_v49, %v285_v33  ;;  %v36_v47 = vld [vmem:[%s1077_s0 + $0x70] sm:$0xff] }
  0x27   :  { %v294_v62 = vadd.f32 %v182_v50, %v134_v45  ;;  %v142_v63 = vmax.f32 %v126_v51, 0.0  ;;  %v190_v0 = vmax.f32 %v174_v52, 0.0  ;;  %v97_v6 = vmul.f32 %v666_v1, %v27_v53  ;;  %v52_v52 = vld [vmem:[%s1077_s0 + $0xf0] sm:$0xff] }
  0x28   :  { %v238_v4 = vmax.f32 %v222_v57, 0.0  ;;  %v270_v5 = vadd.f32 %v671_v2, %v254_v58  ;;  %v151_v7 = vmul.f32 %v666_v1, %v43_v54  ;;  %620 = vmatmul.mubr.msk.f32.gmra.mrb[2].mxu1 %vm346_vm1, %v333_v61  ;;  %v199_v10 = vmul.f32 %v666_v1, %v59_v59  ;;  %v68_v53 = vld [vmem:[%s1077_s0 + $0x170] sm:$0xff]  ;;  %v29_v59 = vld [vmem:[%s1077_s0 + $0x38] sm:$0xff] }
  0x29   :  { %v310_v8 = vadd.f32 %v294_v62, %v230_v55  ;;  %v302_v9 = vadd.f32 %v190_v0, %v142_v63  ;;  %v247_v11 = vmul.f32 %v666_v1, %v75_v60  ;;  %v119_v14 = vadd.f32 %v671_v2, %v97_v6  ;;  %v84_v58 = vld [vmem:[%s1077_s0 + $0x1f0] sm:$0xff]  ;;  %v45_v0 = vld [vmem:[%s1077_s0 + $0xb8] sm:$0xff] }
  0x2a   :  { %v286_v13 = vmax.f32 %v270_v5, 0.0  ;;  %v167_v15 = vadd.f32 %v671_v2, %v151_v7  ;;  %v105_v17 = vmul.f32 %v666_v1, %v35_v3  ;;  %v215_v20 = vadd.f32 %v671_v2, %v199_v10  ;;  %v61_v10 = vld [vmem:[%s1077_s0 + $0x138] sm:$0xff] }
  0x2b   :  { %v326_v18 = vadd.f32 %v310_v8, %v278_v56  ;;  %v318_v19 = vadd.f32 %v302_v9, %v238_v4  ;;  %v263_v21 = vadd.f32 %v671_v2, %v247_v11  ;;  %v135_v23 = vmax.f32 %v119_v14, 0.0 }
  0x2c   :  { %v183_v24 = vmax.f32 %v167_v15, 0.0  ;;  %v127_v25 = vadd.f32 %v671_v2, %v105_v17  ;;  %v159_v26 = vmul.f32 %v666_v1, %v51_v12  ;;  %v231_v31 = vmax.f32 %v215_v20, 0.0  ;;  %v77_v15 = vld [vmem:[%s1077_s0 + $0x1b8] sm:$0xff] }
  0x2d   :  { %610 = vmatprep.mubr.msk.f32.mxu0 %vm346_vm1, %v326_v18  ;;  %v334_v30 = vadd.f32 %v318_v19, %v286_v13  ;;  %v279_v32 = vmax.f32 %v263_v21, 0.0  ;;  %v207_v33 = vmul.f32 %v666_v1, %v67_v16  ;;  %v255_v38 = vmul.f32 %v666_v1, %v83_v22  ;;  %v37_v21 = vld [vmem:[%s1077_s0 + $0x78] sm:$0xff] }
  0x2e   :  { %v295_v35 = vadd.f32 %v183_v24, %v135_v23  ;;  %v143_v36 = vmax.f32 %v127_v25, 0.0  ;;  %v175_v37 = vadd.f32 %v671_v2, %v159_v26  ;;  %v98_v40 = vmul.f32 %v666_v1, %v28_v27  ;;  %v53_v26 = vld [vmem:[%s1077_s0 + $0xf8] sm:$0xff] }
  0x2f   :  { %622 = vmatprep.mubr.msk.f32.mxu1 %vm346_vm1, %v334_v30  ;;  %v223_v39 = vadd.f32 %v671_v2, %v207_v33  ;;  %v152_v41 = vmul.f32 %v666_v1, %v44_v28  ;;  %v200_v42 = vmul.f32 %v666_v1, %v60_v29  ;;  %v271_v45 = vadd.f32 %v671_v2, %v255_v38  ;;  %v69_v27 = vld [vmem:[%s1077_s0 + $0x178] sm:$0xff] }
  0x30   :  { %v311_v43 = vadd.f32 %v295_v35, %v231_v31  ;;  %v191_v44 = vmax.f32 %v175_v37, 0.0  ;;  %v248_v46 = vmul.f32 %v666_v1, %v76_v34  ;;  %v120_v49 = vadd.f32 %v671_v2, %v98_v40  ;;  %v85_v28 = vld [vmem:[%s1077_s0 + $0x1f8] sm:$0xff] }
  0x31   :  { %v239_v48 = vmax.f32 %v223_v39, 0.0  ;;  %v168_v50 = vadd.f32 %v671_v2, %v152_v41  ;;  %v216_v51 = vadd.f32 %v671_v2, %v200_v42  ;;  %v287_v55 = vmax.f32 %v271_v45, 0.0 }
  0x32   :  { %v327_v54 = vadd.f32 %v311_v43, %v279_v32  ;;  %v303_v56 = vadd.f32 %v191_v44, %v143_v36  ;;  %v264_v57 = vadd.f32 %v671_v2, %v248_v46  ;;  %v136_v60 = vmax.f32 %v120_v49, 0.0 }
  0x33   :  { %v184_v61 = vmax.f32 %v168_v50, 0.0  ;;  %v232_v62 = vmax.f32 %v216_v51, 0.0  ;;  %v106_v63 = vmul.f32 %v666_v1, %v36_v47  ;;  %v160_v5 = vmul.f32 %v666_v1, %v52_v52 }
  0x34   :  { %611 = vmatmul.mubr.msk.f32.gmra.mrb[4].mxu0 %vm346_vm1, %v327_v54  ;;  %v319_v3 = vadd.f32 %v303_v56, %v239_v48  ;;  %v280_v4 = vmax.f32 %v264_v57, 0.0  ;;  %v208_v6 = vmul.f32 %v666_v1, %v68_v53  ;;  %v256_v9 = vmul.f32 %v666_v1, %v84_v58 }
  0x35   :  { %v296_v7 = vadd.f32 %v184_v61, %v136_v60  ;;  %v128_v8 = vadd.f32 %v671_v2, %v106_v63  ;;  %v99_v11 = vmul.f32 %v666_v1, %v29_v59  ;;  %v176_v13 = vadd.f32 %v671_v2, %v160_v5 }
  0x36   :  { %v335_v12 = vadd.f32 %v319_v3, %v287_v55  ;;  %v224_v14 = vadd.f32 %v671_v2, %v208_v6  ;;  %v153_v16 = vmul.f32 %v666_v1, %v45_v0  ;;  %v272_v19 = vadd.f32 %v671_v2, %v256_v9 }
  0x37   :  { %v312_v17 = vadd.f32 %v296_v7, %v232_v62  ;;  %v144_v18 = vmax.f32 %v128_v8, 0.0  ;;  %v121_v20 = vadd.f32 %v671_v2, %v99_v11  ;;  %v192_v22 = vmax.f32 %v176_v13, 0.0 }
  0x38   :  { %623 = vmatmul.mubr.msk.f32.gmra.mrb[4].mxu1 %vm346_vm1, %v335_v12  ;;  %v240_v23 = vmax.f32 %v224_v14, 0.0  ;;  %v169_v24 = vadd.f32 %v671_v2, %v153_v16  ;;  %v201_v25 = vmul.f32 %v666_v1, %v61_v10  ;;  %v288_v30 = vmax.f32 %v272_v19, 0.0 }
  0x39   :  { %v328_v29 = vadd.f32 %v312_v17, %v280_v4  ;;  %v137_v31 = vmax.f32 %v121_v20, 0.0  ;;  %v249_v32 = vmul.f32 %v666_v1, %v77_v15  ;;  %v304_v33 = vadd.f32 %v192_v22, %v144_v18 }
  0x3a   :  { %v185_v34 = vmax.f32 %v169_v24, 0.0  ;;  %v217_v35 = vadd.f32 %v671_v2, %v201_v25  ;;  %v107_v36 = vmul.f32 %v666_v1, %v37_v21  ;;  %v161_v38 = vmul.f32 %v666_v1, %v53_v26 }
  0x3b   :  { %613 = vmatprep.mubr.msk.f32.mxu0 %vm346_vm1, %v328_v29  ;;  %v265_v37 = vadd.f32 %v671_v2, %v249_v32  ;;  %v209_v39 = vmul.f32 %v666_v1, %v69_v27  ;;  %v257_v40 = vmul.f32 %v666_v1, %v85_v28  ;;  %v320_v41 = vadd.f32 %v304_v33, %v240_v23 }
  0x3c   :  { %v233_v42 = vmax.f32 %v217_v35, 0.0  ;;  %v297_v43 = vadd.f32 %v185_v34, %v137_v31  ;;  %v129_v44 = vadd.f32 %v671_v2, %v107_v36  ;;  %v177_v46 = vadd.f32 %v671_v2, %v161_v38 }
  0x3d   :  { %v281_v45 = vmax.f32 %v265_v37, 0.0  ;;  %v225_v47 = vadd.f32 %v671_v2, %v209_v39  ;;  %v273_v48 = vadd.f32 %v671_v2, %v257_v40  ;;  %v336_v49 = vadd.f32 %v320_v41, %v288_v30  ;;  %v567_v2 = vld [vmem:[%s1080_s4] ss:$0 sm:$0xff] }
  0x3e   :  { %v313_v50 = vadd.f32 %v297_v43, %v233_v42  ;;  %v145_v51 = vmax.f32 %v129_v44, 0.0  ;;  %v193_v52 = vmax.f32 %v177_v46, 0.0 }
  0x3f   :  { %v241_v53 = vmax.f32 %v225_v47, 0.0  ;;  %625 = vmatprep.mubr.msk.f32.mxu1 %vm346_vm1, %v336_v49  ;;  %v289_v54 = vmax.f32 %v273_v48, 0.0 }
  0x40   :  { %v329_v1 = vadd.f32 %v313_v50, %v281_v45  ;;  %v305_v55 = vadd.f32 %v193_v52, %v145_v51 }
  0x42   :  { %614 = vmatmul.mubr.msk.f32.gmra.mrb[6].mxu0 %vm346_vm1, %v329_v1  ;;  %v321_v56 = vadd.f32 %v305_v55, %v241_v53 }
  0x44   :  { %v337_v57 = vadd.f32 %v321_v56, %v289_v54 }
  0x46   :  { %626 = vmatmul.mubr.msk.f32.gmra.mrb[6].mxu1 %vm346_vm1, %v337_v57 }
  0xe8   :  { %v606_v58 = vpop.f32.mrb[0].mxu0 }
  0xe9   :  { %v471_v59 = vadd.f32 %v606_v58, %v567_v2  ;;  %v465_v60 = vpop.f32.mrb[1].mxu0 }
  0xea   :  { %v466_v61 = vadd.f32 %v567_v2, %v465_v60 }
  0xeb   :  { %546 = vst.msk [vmem:[%s1081_s5 + $0x8] sm:$0xff] %vm544_vm2, %v471_v59 }
  0xec   :  { %545 = vst.msk [vmem:[%s1081_s5] sm:$0xff] %vm544_vm2, %v466_v61 }
  0xed   :  { %v618_v62 = vpop.f32.mrb[0].mxu1 }
  0xee   :  { %v511_v63 = vadd.f32 %v618_v62, %v567_v2  ;;  %v505_v0 = vpop.f32.mrb[1].mxu1 }
  0xef   :  { %v506_v3 = vadd.f32 %v567_v2, %v505_v0 }
  0xf0   :  { %554 = vst.msk [vmem:[%s1081_s5 + $0x48] sm:$0xff] %vm544_vm2, %v511_v63 }
  0xf1   :  { %553 = vst.msk [vmem:[%s1081_s5 + $0x40] sm:$0xff] %vm544_vm2, %v506_v3 }
  0xf7   :  { %v609_v4 = vpop.f32.mrb[2].mxu0 }
  0xf8   :  { %v481_v5 = vadd.f32 %v609_v4, %v567_v2  ;;  %v475_v6 = vpop.f32.mrb[3].mxu0 }
  0xf9   :  { %v476_v7 = vadd.f32 %v567_v2, %v475_v6 }
  0xfa   :  { %548 = vst.msk [vmem:[%s1081_s5 + $0x18] sm:$0xff] %vm544_vm2, %v481_v5 }
  0xfb   :  { %547 = vst.msk [vmem:[%s1081_s5 + $0x10] sm:$0xff] %vm544_vm2, %v476_v7  ;;  %v621_v8 = vpop.f32.mrb[2].mxu1 }
  0xfc   :  { %v521_v9 = vadd.f32 %v621_v8, %v567_v2  ;;  %v515_v10 = vpop.f32.mrb[3].mxu1 }
  0xfd   :  { %v516_v11 = vadd.f32 %v567_v2, %v515_v10 }
  0xfe   :  { %556 = vst.msk [vmem:[%s1081_s5 + $0x58] sm:$0xff] %vm544_vm2, %v521_v9 }
  0xff   :  { %555 = vst.msk [vmem:[%s1081_s5 + $0x50] sm:$0xff] %vm544_vm2, %v516_v11 }
 0x107   :  { %v612_v12 = vpop.f32.mrb[4].mxu0 }
 0x108   :  { %v491_v13 = vadd.f32 %v612_v12, %v567_v2  ;;  %v485_v14 = vpop.f32.mrb[5].mxu0 }
 0x109   :  { %v486_v15 = vadd.f32 %v567_v2, %v485_v14 }
 0x10a   :  { %550 = vst.msk [vmem:[%s1081_s5 + $0x28] sm:$0xff] %vm544_vm2, %v491_v13 }
 0x10b   :  { %v624_v16 = vpop.f32.mrb[4].mxu1  ;;  %549 = vst.msk [vmem:[%s1081_s5 + $0x20] sm:$0xff] %vm544_vm2, %v486_v15 }
 0x10c   :  { %v531_v17 = vadd.f32 %v624_v16, %v567_v2  ;;  %v525_v18 = vpop.f32.mrb[5].mxu1 }
 0x10d   :  { %v526_v19 = vadd.f32 %v567_v2, %v525_v18 }
 0x10e   :  { %558 = vst.msk [vmem:[%s1081_s5 + $0x68] sm:$0xff] %vm544_vm2, %v531_v17 }
 0x10f   :  { %557 = vst.msk [vmem:[%s1081_s5 + $0x60] sm:$0xff] %vm544_vm2, %v526_v19 }
 0x115   :  { %v615_v20 = vpop.f32.mrb[6].mxu0 }
 0x116   :  { %v501_v21 = vadd.f32 %v615_v20, %v567_v2  ;;  %v495_v22 = vpop.f32.mrb[7].mxu0 }
 0x117   :  { %v496_v23 = vadd.f32 %v567_v2, %v495_v22 }
 0x118   :  { %552 = vst.msk [vmem:[%s1081_s5 + $0x38] sm:$0xff] %vm544_vm2, %v501_v21 }
 0x119   :  { %551 = vst.msk [vmem:[%s1081_s5 + $0x30] sm:$0xff] %vm544_vm2, %v496_v23  ;;  %v627_v24 = vpop.f32.mrb[6].mxu1 }
 0x11a   :  { %v541_v25 = vadd.f32 %v627_v24, %v567_v2  ;;  %v535_v26 = vpop.f32.mrb[7].mxu1 }
 0x11b   :  { %v536_v27 = vadd.f32 %v567_v2, %v535_v26 }
 0x11c   :  { %560 = vst.msk [vmem:[%s1081_s5 + $0x78] sm:$0xff] %vm544_vm2, %v541_v25 }
 0x11d   :  { %559 = vst.msk [vmem:[%s1081_s5 + $0x70] sm:$0xff] %vm544_vm2, %v536_v27 }

</bundles_post_ra>
